<compile_context>
chip_gen: v6e
topology: v6e:2x2x1
jax: 0.10.0
libtpu: 0.0.40
codegen_flags: <defaults>
</compile_context>

<pallas_src>
import functools

import jax
import jax.numpy as jnp
from jax.experimental import pallas as pl
from jax.experimental.pallas import tpu as pltpu

_LANE = 128
_SUBLANE = 8


def _round_up(v, m):
    return -(-v // m) * m


def _sigmoid_approx(z):
    # 1 / (1 + exp(-z)); exp and approx reciprocal both run on the EUP slot.
    return pl.reciprocal(1.0 + jnp.exp(-z), approx=True)


def _mlp_kernel(x_ref, w1_ref, b1_ref, w2_ref, b2_ref, w3_ref, b3_ref, o_ref):
    # In-kernel bf16 cast of the streamed input (saves a separate XLA pass).
    x = x_ref[...].astype(jnp.bfloat16)
    # Layer 1: (tb, D_in)bf16 @ (D_in, H1)bf16 -> f32 acc; bias + sigmoid in f32.
    h = jnp.dot(x, w1_ref[...], preferred_element_type=jnp.float32)
    h = _sigmoid_approx(h + b1_ref[...])
    # Layer 2 (hidden activations cast back to bf16 for the MXU).
    h = jnp.dot(h.astype(jnp.bfloat16), w2_ref[...],
                preferred_element_type=jnp.float32)
    h = _sigmoid_approx(h + b2_ref[...])
    # Layer 3: 128-lane-padded weights keep the matmul MXU-friendly; exact
    # sigmoid on the output layer. Padded columns are sliced off before the
    # store so HBM writeback stays at the true d_out width.
    h = jnp.dot(h.astype(jnp.bfloat16), w3_ref[...],
                preferred_element_type=jnp.float32)
    h = jax.nn.sigmoid(h + b3_ref[...])
    o_ref[...] = h[:, :o_ref.shape[1]].astype(o_ref.dtype)


def _as_row(b):
    # Accept both (n,) (PyTorch export layout) and (1, n) biases.
    return b.reshape(1, -1) if b.ndim == 1 else b


@functools.partial(jax.jit, static_argnames=("batch_tile",))
def depression_net_forward(x, w1, b1, w2, b2, w3, b3, *, batch_tile=2048):
    b1, b2, b3 = _as_row(b1), _as_row(b2), _as_row(b3)

    B, d_in = x.shape
    h1 = w1.shape[1]
    h2 = w2.shape[1]
    d_out = w3.shape[1]
    out_dtype = x.dtype

    # ---- 128-lane-pad W3/b3 for the in-kernel matmul only (HBM out is unpadded)
    d_out_p = _round_up(d_out, _LANE)
    w3p = jnp.pad(w3, ((0, 0), (0, d_out_p - d_out)))
    b3p = jnp.pad(b3, ((0, 0), (0, d_out_p - d_out)))

    # ---- bf16 MXU weights, f32 biases; x stays in its original dtype ---------
    w1c = w1.astype(jnp.bfloat16)
    w2c = w2.astype(jnp.bfloat16)
    w3c = w3p.astype(jnp.bfloat16)
    b1c = b1.astype(jnp.float32)
    b2c = b2.astype(jnp.float32)
    b3c = b3p.astype(jnp.float32)
    x_in = x.astype(jnp.float32)

    # ---- batch tiling ---------------------------------------------------------
    b_ceil = _round_up(B, _SUBLANE)
    if b_ceil <= batch_tile:
        # Small batch: single grid step covering the whole (padded) batch.
        tb = b_ceil
    else:
        # Large batch: big tiles to amortise per-step overhead, but guarantee an
        # even number (>= 2) of grid steps so v7x's two TensorCores both get
        # work through the "parallel" dimension semantics.
        tb = _round_up(min(batch_tile, pl.cdiv(b_ceil, 2)), _SUBLANE)
        steps = pl.cdiv(b_ceil, tb)
        if steps % 2:
            steps += 1
            tb = _round_up(pl.cdiv(b_ceil, steps), _SUBLANE)
    B_p = pl.cdiv(B, tb) * tb
    if B_p != B:
        x_in = jnp.pad(x_in, ((0, B_p - B), (0, 0)))
    grid = (B_p // tb,)

    # ---- VMEM budget: actual requirement + headroom (no floor, <= 48 MiB) ----
    out_bytes = jnp.dtype(out_dtype).itemsize
    x_tile_b = tb * d_in * 4                               # f32 input tile
    o_tile_b = tb * _round_up(d_out, _LANE) * out_bytes    # lane-padded VMEM layout
    w_b = (d_in * h1 + h1 * h2 + h2 * d_out_p) * 2         # bf16 weights
    bias_b = (_round_up(h1, _LANE) + _round_up(h2, _LANE) + d_out_p) * _SUBLANE * 4
    act_b = tb * (h1 + h2 + d_out_p) * 6                   # f32 + bf16 working copies
    vmem_bytes = int(min(2 * (x_tile_b + o_tile_b + w_b + bias_b) + act_b + (8 << 20),
                         48 << 20))

    cost = pl.CostEstimate(
        flops=2 * B_p * (d_in * h1 + h1 * h2 + h2 * d_out_p),
        transcendentals=B_p * (h1 + h2 + d_out_p),
        bytes_accessed=B_p * d_in * 4 + w_b + bias_b + B_p * d_out * out_bytes,
    )

    in_specs = [
        pl.BlockSpec((tb, d_in), lambda i: (i, 0)),      # x tile (streamed, f32)
        pl.BlockSpec((d_in, h1), lambda i: (0, 0)),      # w1 (resident)
        pl.BlockSpec((1, h1), lambda i: (0, 0)),         # b1
        pl.BlockSpec((h1, h2), lambda i: (0, 0)),        # w2
        pl.BlockSpec((1, h2), lambda i: (0, 0)),         # b2
        pl.BlockSpec((h2, d_out_p), lambda i: (0, 0)),   # w3 (lane-padded, kernel-only)
        pl.BlockSpec((1, d_out_p), lambda i: (0, 0)),    # b3 (lane-padded, kernel-only)
    ]
    # Unpadded output in HBM: last block dim equals the full array dim (legal),
    # so writeback is B_p * d_out elements instead of B_p * 128.
    out_spec = pl.BlockSpec((tb, d_out), lambda i: (i, 0))

    out_p = pl.pallas_call(
        _mlp_kernel,
        out_shape=jax.ShapeDtypeStruct((B_p, d_out), out_dtype),
        grid_spec=pl.GridSpec(grid=grid, in_specs=in_specs, out_specs=out_spec),
        compiler_params=pltpu.CompilerParams(
            dimension_semantics=("parallel",),
            vmem_limit_bytes=vmem_bytes,
        ),
        cost_estimate=cost,
    )(x_in, w1c, b1c, w2c, b2c, w3c, b3c)

    # Strip batch padding back to the module's output shape.
    return out_p[:B, :]


def init_params(key, input_size, hidden_sizes, output_size, dtype=jnp.float32):
    """Deterministic synthetic init (not a checkpoint load)."""
    k1, k2, k3, k4, k5, k6 = jax.random.split(key, 6)
    h1, h2 = hidden_sizes
    # Stored as (in, out) so the kernel does x @ W + b  (== PyTorch x @ W.T + b).
    w1 = jax.random.normal(k1, (input_size, h1), dtype) * 0.1
    b1 = jax.random.normal(k2, (1, h1), dtype) * 0.1
    w2 = jax.random.normal(k3, (h1, h2), dtype) * 0.1
    b2 = jax.random.normal(k4, (1, h2), dtype) * 0.1
    w3 = jax.random.normal(k5, (h2, output_size), dtype) * 0.1
    b3 = jax.random.normal(k6, (1, output_size), dtype) * 0.1
    return w1, b1, w2, b2, w3, b3


def reference_forward(x, w1, b1, w2, b2, w3, b3):
    """Pure-JAX f32 reference matching the PyTorch forward semantics."""
    h = jax.nn.sigmoid(x @ w1 + _as_row(b1))
    h = jax.nn.sigmoid(h @ w2 + _as_row(b2))
    return jax.nn.sigmoid(h @ w3 + _as_row(b3))


if __name__ == "__main__":
    # Small shapes consistent with the module (x is (batch, input_size)).
    batch = 16
    input_size = 32
    hidden_sizes = (64, 32)
    output_size = 8

    key = jax.random.PRNGKey(0)
    kx, kp = jax.random.split(key)
    x = jax.random.normal(kx, (batch, input_size), jnp.float32)
    params = init_params(kp, input_size, hidden_sizes, output_size)

    out = depression_net_forward(x, *params)
    out = jax.block_until_ready(out)

    ref = reference_forward(x, *params)
    assert out.shape == (batch, output_size)
    # bf16 MXU inputs with f32 accumulation: loose-ish tolerance vs f32 reference.
    assert jnp.allclose(out, ref, atol=2e-2, rtol=2e-2), "mismatch vs reference"

    print("KERNEL_OK")
</pallas_src>

<mosaic_0001>
module attributes {stable_mosaic.version = 11 : i64} {
  func.func @_mlp_kernel(%arg0: i32, %arg1: memref<16x32xf32, #tpu.memory_space<vmem>>, %arg2: memref<32x64xbf16, #tpu.memory_space<vmem>>, %arg3: memref<1x64xf32, #tpu.memory_space<vmem>>, %arg4: memref<64x32xbf16, #tpu.memory_space<vmem>>, %arg5: memref<1x32xf32, #tpu.memory_space<vmem>>, %arg6: memref<32x128xbf16, #tpu.memory_space<vmem>>, %arg7: memref<1x128xf32, #tpu.memory_space<vmem>>, %arg8: memref<16x8xf32, #tpu.memory_space<vmem>>) attributes {dimension_semantics = [#tpu.dimension_semantics<parallel>], iteration_bounds = array<i64: 1>, scalar_prefetch = 0 : i64, scratch_operands = 0 : i64, tpu.core_type = #tpu.core_type<tc>, window_params = [{transform_indices = @transform_0, window_bounds = array<i64: 16, 32>}, {pipeline_mode = #tpu.pipeline_mode<synchronous>, transform_indices = @transform_1, window_bounds = array<i64: 32, 64>}, {pipeline_mode = #tpu.pipeline_mode<synchronous>, transform_indices = @transform_2, window_bounds = array<i64: 1, 64>}, {pipeline_mode = #tpu.pipeline_mode<synchronous>, transform_indices = @transform_3, window_bounds = array<i64: 64, 32>}, {pipeline_mode = #tpu.pipeline_mode<synchronous>, transform_indices = @transform_4, window_bounds = array<i64: 1, 32>}, {pipeline_mode = #tpu.pipeline_mode<synchronous>, transform_indices = @transform_5, window_bounds = array<i64: 32, 128>}, {pipeline_mode = #tpu.pipeline_mode<synchronous>, transform_indices = @transform_6, window_bounds = array<i64: 1, 128>}, {transform_indices = @transform_7, window_bounds = array<i64: 16, 8>}]} {
    %c0 = arith.constant 0 : index
    %c0_0 = arith.constant 0 : index
    %0 = vector.load %arg1[%c0, %c0_0] : memref<16x32xf32, #tpu.memory_space<vmem>>, vector<16x32xf32>
    %1 = arith.truncf %0 : vector<16x32xf32> to vector<16x32xbf16>
    %c0_1 = arith.constant 0 : index
    %c0_2 = arith.constant 0 : index
    %2 = vector.load %arg2[%c0_1, %c0_2] : memref<32x64xbf16, #tpu.memory_space<vmem>>, vector<32x64xbf16>
    %cst = arith.constant dense<0.000000e+00> : vector<16x64xf32>
    %3 = tpu.matmul %1, %2, %cst {dimension_numbers = #tpu.dot_dimension_numbers<[1], [0], [0], [1], [0, 0, 1, 1], [], []>} : vector<16x32xbf16>, vector<32x64xbf16>, vector<16x64xf32> -> vector<16x64xf32>
    %c0_3 = arith.constant 0 : index
    %c0_4 = arith.constant 0 : index
    %4 = vector.load %arg3[%c0_3, %c0_4] : memref<1x64xf32, #tpu.memory_space<vmem>>, vector<1x64xf32>
    %5 = vector.broadcast %4 : vector<1x64xf32> to vector<16x64xf32>
    %6 = arith.addf %3, %5 : vector<16x64xf32>
    %cst_5 = arith.constant 0.000000e+00 : f32
    %7 = vector.broadcast %cst_5 : f32 to vector<16x64xf32>
    %8 = arith.subf %7, %6 : vector<16x64xf32>
    %9 = math.exp %8 : vector<16x64xf32>
    %cst_6 = arith.constant 1.000000e+00 : f32
    %10 = vector.broadcast %cst_6 : f32 to vector<16x64xf32>
    %11 = arith.addf %10, %9 : vector<16x64xf32>
    %12 = tpu.reciprocal %11 {approx = true} : vector<16x64xf32> -> vector<16x64xf32>
    %13 = arith.truncf %12 : vector<16x64xf32> to vector<16x64xbf16>
    %c0_7 = arith.constant 0 : index
    %c0_8 = arith.constant 0 : index
    %14 = vector.load %arg4[%c0_7, %c0_8] : memref<64x32xbf16, #tpu.memory_space<vmem>>, vector<64x32xbf16>
    %cst_9 = arith.constant dense<0.000000e+00> : vector<16x32xf32>
    %15 = tpu.matmul %13, %14, %cst_9 {dimension_numbers = #tpu.dot_dimension_numbers<[1], [0], [0], [1], [0, 0, 1, 1], [], []>} : vector<16x64xbf16>, vector<64x32xbf16>, vector<16x32xf32> -> vector<16x32xf32>
    %c0_10 = arith.constant 0 : index
    %c0_11 = arith.constant 0 : index
    %16 = vector.load %arg5[%c0_10, %c0_11] : memref<1x32xf32, #tpu.memory_space<vmem>>, vector<1x32xf32>
    %17 = vector.broadcast %16 : vector<1x32xf32> to vector<16x32xf32>
    %18 = arith.addf %15, %17 : vector<16x32xf32>
    %cst_12 = arith.constant 0.000000e+00 : f32
    %19 = vector.broadcast %cst_12 : f32 to vector<16x32xf32>
    %20 = arith.subf %19, %18 : vector<16x32xf32>
    %21 = math.exp %20 : vector<16x32xf32>
    %cst_13 = arith.constant 1.000000e+00 : f32
    %22 = vector.broadcast %cst_13 : f32 to vector<16x32xf32>
    %23 = arith.addf %22, %21 : vector<16x32xf32>
    %24 = tpu.reciprocal %23 {approx = true} : vector<16x32xf32> -> vector<16x32xf32>
    %25 = arith.truncf %24 : vector<16x32xf32> to vector<16x32xbf16>
    %c0_14 = arith.constant 0 : index
    %c0_15 = arith.constant 0 : index
    %26 = vector.load %arg6[%c0_14, %c0_15] : memref<32x128xbf16, #tpu.memory_space<vmem>>, vector<32x128xbf16>
    %cst_16 = arith.constant dense<0.000000e+00> : vector<16x128xf32>
    %27 = tpu.matmul %25, %26, %cst_16 {dimension_numbers = #tpu.dot_dimension_numbers<[1], [0], [0], [1], [0, 0, 1, 1], [], []>} : vector<16x32xbf16>, vector<32x128xbf16>, vector<16x128xf32> -> vector<16x128xf32>
    %c0_17 = arith.constant 0 : index
    %c0_18 = arith.constant 0 : index
    %28 = vector.load %arg7[%c0_17, %c0_18] : memref<1x128xf32, #tpu.memory_space<vmem>>, vector<1x128xf32>
    %29 = vector.broadcast %28 : vector<1x128xf32> to vector<16x128xf32>
    %30 = arith.addf %27, %29 : vector<16x128xf32>
    %31 = arith.negf %30 : vector<16x128xf32>
    %32 = math.exp %31 : vector<16x128xf32>
    %cst_19 = arith.constant 1.000000e+00 : f32
    %33 = vector.broadcast %cst_19 : f32 to vector<16x128xf32>
    %34 = arith.addf %33, %32 : vector<16x128xf32>
    %35 = arith.divf %33, %34 : vector<16x128xf32>
    %36 = vector.extract_strided_slice %35 {offsets = [0, 0], sizes = [16, 8], strides = [1, 1]} : vector<16x128xf32> to vector<16x8xf32>
    %c0_20 = arith.constant 0 : index
    %c0_21 = arith.constant 0 : index
    %37 = vector.load %arg8[%c0_20, %c0_21] : memref<16x8xf32, #tpu.memory_space<vmem>>, vector<16x8xf32>
    tpu.vector_store %arg8[%c0_20, %c0_21], %36 {strides = array<i32>} : memref<16x8xf32, #tpu.memory_space<vmem>>, vector<16x8xf32>,
    return
  }
  func.func @transform_0(%arg0: i32) -> (i32, i32) {
    %c0_i32 = arith.constant 0 : i32
    %c0_i32_0 = arith.constant 0 : i32
    return %arg0, %c0_i32 : i32, i32
  }
  func.func @transform_1(%arg0: i32) -> (i32, i32) {
    %c0_i32 = arith.constant 0 : i32
    %c0_i32_0 = arith.constant 0 : i32
    %c0_i32_1 = arith.constant 0 : i32
    return %c0_i32, %c0_i32_0 : i32, i32
  }
  func.func @transform_2(%arg0: i32) -> (i32, i32) {
    %c0_i32 = arith.constant 0 : i32
    %c0_i32_0 = arith.constant 0 : i32
    %c0_i32_1 = arith.constant 0 : i32
    return %c0_i32, %c0_i32_0 : i32, i32
  }
  func.func @transform_3(%arg0: i32) -> (i32, i32) {
    %c0_i32 = arith.constant 0 : i32
    %c0_i32_0 = arith.constant 0 : i32
    %c0_i32_1 = arith.constant 0 : i32
    return %c0_i32, %c0_i32_0 : i32, i32
  }
  func.func @transform_4(%arg0: i32) -> (i32, i32) {
    %c0_i32 = arith.constant 0 : i32
    %c0_i32_0 = arith.constant 0 : i32
    %c0_i32_1 = arith.constant 0 : i32
    return %c0_i32, %c0_i32_0 : i32, i32
  }
  func.func @transform_5(%arg0: i32) -> (i32, i32) {
    %c0_i32 = arith.constant 0 : i32
    %c0_i32_0 = arith.constant 0 : i32
    %c0_i32_1 = arith.constant 0 : i32
    return %c0_i32, %c0_i32_0 : i32, i32
  }
  func.func @transform_6(%arg0: i32) -> (i32, i32) {
    %c0_i32 = arith.constant 0 : i32
    %c0_i32_0 = arith.constant 0 : i32
    %c0_i32_1 = arith.constant 0 : i32
    return %c0_i32, %c0_i32_0 : i32, i32
  }
  func.func @transform_7(%arg0: i32) -> (i32, i32) {
    %c0_i32 = arith.constant 0 : i32
    %c0_i32_0 = arith.constant 0 : i32
    return %arg0, %c0_i32 : i32, i32
  }
}

</mosaic_0001>

<bundles_post_ra>
// kernel: depression_net_forward.1
= control target key start
LH: loop header
LB: loop body
LE: loop exit
PB: predicated region body
PF: predicated region fallthrough
CT: control target
= control target key end

     0   :  { %v379_v0 = vmov 0.0   ;;  %vm380_vm0 = vmmov 0   ;;  %vm53_vm1 = vcmask 261120   ;;  %vm148_vm2 = vcmask 523264   ;;  %s468_s1 = inlined_call_operand.vmem [shape: bf16[32,64], index: 1, kind: input, shape index: {}]   ;;  %s469_s0 = inlined_call_operand.vmem [shape: f32[16,32], index: 0, kind: input, shape index: {}]   ;;  %s470_s3 = inlined_call_operand.vmem [shape: bf16[64,32], index: 3, kind: input, shape index: {}]   ;;  %s471_s2 = inlined_call_operand.vmem [shape: f32[1,64], index: 2, kind: input, shape index: {}]   ;;  %s472_s5 = inlined_call_operand.vmem [shape: bf16[32,128], index: 5, kind: input, shape index: {}]   ;;  %s473_s4 = inlined_call_operand.vmem [shape: f32[1,32], index: 4, kind: input, shape index: {}]   ;;  %s474_s6 = inlined_call_operand.vmem [shape: f32[1,128], index: 6, kind: input, shape index: {}]   ;;  %s475_s7 = inlined_call_operand.vmem [shape: f32[16,8], index: 7, kind: output, shape index: {}]  }
   0x1   :  { %317 = vmatprep.subr.bf16.mxu0 %v379_v0  ;;  %v347_v1 = vld [vmem:[%s468_s1 + $0x8] sm:$0xff]   ;;  %321 = vmatprep.mubr.msk.bf16.mxu0 %vm380_vm0, %v379_v0  ;;  %v348_v2 = vld [vmem:[%s468_s1] sm:$0xff]   ;;  %v349_v6 = vld [vmem:[%s470_s3 + $0x18] sm:$0xff]   ;;  %vm283_vm3 = vcmask 64512  }
   0x2   :  { %325 = vmatprep.subr.bf16.mxu1 %v379_v0  ;;  %333 = vmatprep.mubr.msk.bf16.mxu1 %vm380_vm0, %v379_v0  ;;  %v27_v3 = vld [vmem:[%s469_s0] sm:$0xff]  ;;  %v28_v4 = vld [vmem:[%s469_s0 + $0x8] sm:$0xff]  ;;  %v350_v7 = vld [vmem:[%s470_s3 + $0x10] sm:$0xff]  }
   0x3   :  { %318 = vmatpush3.bf16.msra.mxu0 %v347_v1  ;;  %v29_v5 = vpack.c.bf16 %v28_v4, %v27_v3  ;;  %326 = vmatpush3.bf16.msra.mxu1 %v349_v6  ;;  %v351_v8 = vld [vmem:[%s470_s3 + $0x8] sm:$0xff]   ;;  %v352_v9 = vld [vmem:[%s470_s3] sm:$0xff]  }
   0x4   :  { %319 = vmatprep.subr.bf16.mxu0 %v379_v0  ;;  %327 = vmatprep.subr.bf16.mxu1 %v379_v0  ;;  %v290_v10 = vld [vmem:[%s471_s2] ss:$0 sm:$0xff]  ;;  %v353_v28 = vld [vmem:[%s472_s5 + $0x8] sm:$0xff]  }
   0x5   :  { %v354_v29 = vld [vmem:[%s472_s5] sm:$0xff]  }
   0x6   :  { %v294_v30 = vld [vmem:[%s473_s4] ss:$0 sm:$0xff] }
   0x7   :  { %320 = vmatpush3.bf16.msra.mxu0 %v348_v2  ;;  %328 = vmatpush3.bf16.msra.mxu1 %v350_v7  ;;  %v300_v48 = vld [vmem:[%s474_s6] ss:$0 sm:$0xff] }
   0x8   :  { %337 = vmatprep.subr.bf16.mxu0 %v379_v0  ;;  %329 = vmatprep.subr.bf16.mxu1 %v379_v0 }
   0xa   :  { %322 = vmatmul.mubr.msk.bf16.vlgmr.msra.gmra.mxu0 %vm53_vm1, %v29_v5 }
   0xb   :  { %341 = vmatprep.mubr.msk.bf16.mxu0 %vm380_vm0, %v379_v0  ;;  %330 = vmatpush3.bf16.msra.mxu1 %v351_v8 }
   0xc   :  { %331 = vmatprep.subr.bf16.mxu1 %v379_v0  ;;  %338 = vmatpush3.bf16.msra.mxu0 %v353_v28 }
   0xd   :  { %339 = vmatprep.subr.bf16.mxu0 %v379_v0 }
   0xf   :  { %332 = vmatpush3.bf16.msra.mxu1 %v352_v9 }
  0x10   :  { %340 = vmatpush3.bf16.msra.mxu0 %v354_v29 }
  0xca   :  { %v91_v11 = vpop.f32.mrf.mxu0 }
  0xcb   :  { %v92_v12 = vadd.f32 %v290_v10, %v91_v11 }
  0xcc   :  { %v323_v13 = vpop.f32.mrf.mxu0 }
  0xcd   :  { %v98_v14 = vsub.f32 0.0, %v92_v12 }
  0xce   :  { %v94_v15 = vpop.f32.mrf.mxu0 }
  0xcf   :  { %v100_v16 = vmul.f32 1.442695, %v98_v14  ;;  %v95_v17 = vadd.f32 %v290_v10, %v94_v15 }
  0xd0   :  { %v324_v18 = vpop.f32.mrf.mxu0 }
  0xd1   :  { %355 = vpow2.f32 %v100_v16  ;;  %v99_v19 = vsub.f32 0.0, %v95_v17 }
  0xd3   :  { %v102_v20 = vmul.f32 1.442695, %v99_v19 }
  0xd5   :  { %357 = vpow2.f32 %v102_v20 }
  0xde   :  { %v356_v21 = vpop.eup %355 }
  0xdf   :  { %v104_v22 = vadd.f32 1.0, %v356_v21 }
  0xe1   :  { %359 = vrcp.f32 %v104_v22 }
  0xe2   :  { %v358_v23 = vpop.eup %357 }
  0xe3   :  { %v105_v24 = vadd.f32 1.0, %v358_v23 }
  0xe5   :  { %361 = vrcp.f32 %v105_v24 }
  0xee   :  { %v360_v25 = vpop.eup %359 }
  0xf2   :  { %v362_v26 = vpop.eup %361 }
  0xf3   :  { %v108_v27 = vpack.c.bf16 %v362_v26, %v360_v25 }
  0xf5   :  { %334 = vmatmul.mubr.msk.bf16.vlgmr.msra.gmra.mxu1 %vm148_vm2, %v108_v27 }
 0x1b5   :  { %v186_v31 = vpop.f32.mrf.mxu1 }
 0x1b6   :  { %v187_v32 = vadd.f32 %v294_v30, %v186_v31 }
 0x1b7   :  { %v335_v33 = vpop.f32.mrf.mxu1 }
 0x1b8   :  { %v193_v34 = vsub.f32 0.0, %v187_v32 }
 0x1b9   :  { %v189_v35 = vpop.f32.mrf.mxu1 }
 0x1ba   :  { %v195_v36 = vmul.f32 1.442695, %v193_v34  ;;  %v190_v37 = vadd.f32 %v294_v30, %v189_v35 }
 0x1bb   :  { %v336_v38 = vpop.f32.mrf.mxu1 }
 0x1bc   :  { %363 = vpow2.f32 %v195_v36  ;;  %v194_v39 = vsub.f32 0.0, %v190_v37 }
 0x1be   :  { %v197_v40 = vmul.f32 1.442695, %v194_v39 }
 0x1c0   :  { %365 = vpow2.f32 %v197_v40 }
 0x1c9   :  { %v364_v41 = vpop.eup %363 }
 0x1ca   :  { %v199_v42 = vadd.f32 1.0, %v364_v41 }
 0x1cc   :  { %367 = vrcp.f32 %v199_v42 }
 0x1cd   :  { %v366_v43 = vpop.eup %365 }
 0x1ce   :  { %v200_v44 = vadd.f32 1.0, %v366_v43 }
 0x1d0   :  { %369 = vrcp.f32 %v200_v44 }
 0x1d9   :  { %v368_v45 = vpop.eup %367 }
 0x1dd   :  { %v370_v46 = vpop.eup %369 }
 0x1de   :  { %v203_v47 = vpack.c.bf16 %v370_v46, %v368_v45 }
 0x1e0   :  { %342 = vmatmul.mubr.msk.bf16.vlgmr.msra.gmra.mxu0 %vm53_vm1, %v203_v47 }
 0x2a0   :  { %v264_v49 = vpop.f32.mrf.mxu0 }
 0x2a1   :  { %v265_v50 = vadd.f32 %v300_v48, %v264_v49 }
 0x2a2   :  { %v343_v51 = vpop.f32.mrf.mxu0 }
 0x2a3   :  { %v304_v52 = vmul.f32 -1.442695, %v265_v50 }
 0x2a4   :  { %v267_v53 = vpop.f32.mrf.mxu0 }
 0x2a5   :  { %371 = vpow2.f32 %v304_v52  ;;  %v268_v54 = vadd.f32 %v300_v48, %v267_v53 }
 0x2a6   :  { %v344_v55 = vpop.f32.mrf.mxu0 }
 0x2a7   :  { %v305_v56 = vmul.f32 -1.442695, %v268_v54 }
 0x2a9   :  { %373 = vpow2.f32 %v305_v56 }
 0x2b2   :  { %v372_v57 = vpop.eup %371 }
 0x2b3   :  { %v277_v58 = vadd.f32 1.0, %v372_v57 }
 0x2b5   :  { %375 = vrcp.f32 %v277_v58 }
 0x2b6   :  { %v374_v59 = vpop.eup %373 }
 0x2b7   :  { %v278_v60 = vadd.f32 1.0, %v374_v59 }
 0x2b9   :  { %377 = vrcp.f32 %v278_v60 }
 0x2c2   :  { %v376_v61 = vpop.eup %375 }
 0x2c3   :  { %284 = vst.msk [vmem:[%s475_s7] sm:$0xff] %vm283_vm3, %v376_v61 }
 0x2c6   :  { %v378_v62 = vpop.eup %377 }
 0x2c7   :  { %285 = vst.msk [vmem:[%s475_s7 + $0x8] sm:$0xff] %vm283_vm3, %v378_v62 }

</bundles_post_ra>
